<compile_context>
chip_gen: v6e
topology: v6e:2x2x1
jax: 0.10.0
libtpu: 0.0.40
codegen_flags: <defaults>
</compile_context>

<pallas_src>
import jax
import jax.numpy as jnp
from jax.experimental import pallas as pl
from jax.experimental.pallas import tpu as pltpu

LANES = 128  # TPU lane width; all packed slabs are 128-lane dense.


# ------------------------------ fused kernel --------------------------------

def make_predict_kernel(n_users, conv_in_dims, pred_offsets):
    """Whole predict path for a fixed conv stack.

    Operand layouts (see pack_static):
      x_ref    [N, 128]        per-call features (lanes 0:F; non-user rows 0)
      adj_ref  [N, N]          dense dst-by-src edge-multiplicity matrix (f32)
      node_ref [2, N, 128]     plane 0: adjusted fixed embeddings (lanes 0:E)
                               plane 1: weighted in-degree, broadcast over lanes
      w_ref    [n_w, 128, 128] zero-padded weights (encoder, convs, heads)
      b_ref    [8, 128]        one lane-padded bias row per linear layer
      out_ref  [n_users, 128]  fused segment|nudge logits (lane-padded)
    """
    n_conv = len(conv_in_dims)

    def kernel(x_ref, adj_ref, node_ref, w_ref, b_ref, out_ref):
        adj = adj_ref[...]
        base = node_ref[0]                        # adjusted fixed embeddings
        deg = node_ref[1]                         # in-degree (lane-broadcast)

        # Feature encoder on all rows.  Non-user rows of x_ref are zero; the
        # resulting constant relu(b1)@W2+b2 was pre-subtracted from `base`, so
        # x == cat([encoder(user_feats), segment_embed, nudge_embed]) exactly.
        h = jnp.maximum(
            jnp.dot(x_ref[...], w_ref[0], preferred_element_type=jnp.float32)
            + b_ref[0:1, :], 0.0)
        x = (jnp.dot(h, w_ref[1], preferred_element_type=jnp.float32)
             + b_ref[1:2, :] + base)              # [N,128], nonzero lanes 0:E

        feat = x[:n_users]                        # lane-concat of [x0|x1|x2|...]
        for l in range(n_conv):
            d_in = conv_in_dims[l]
            # BiInteractionConv (aggr='add', no edge_weight):
            #   (deg*x + A@x) @ W1 + (x * A@x) @ W2 + deg*(b1+b2)
            # W1/W2 are pre-stacked row-wise -> ONE matmul; the bi-term is
            # rotated into its own lane range on the (otherwise idle) XLU.
            ax = jnp.dot(adj, x, preferred_element_type=jnp.float32)
            lhs = deg * x + ax + pltpu.roll(x * ax, shift=d_in, axis=1)
            hc = (jnp.dot(lhs, w_ref[2 + l], preferred_element_type=jnp.float32)
                  + deg * b_ref[2 + l:3 + l, :])
            hc = jnp.maximum(hc, 0.01 * hc)       # LeakyReLU(0.01)
            ss = jnp.sum(hc * hc, axis=1, keepdims=True)
            # F.normalize(p=2, eps=1e-12): rsqrt(max(ss, 1e-24)) because
            # 1e-24 == (1e-12)**2 — keep the two constants in sync.
            x = hc * jax.lax.rsqrt(jnp.maximum(ss, 1e-24))
            # Deferred predictor input: lane-concat this layer's user rows.
            feat = feat + pltpu.roll(x[:n_users], shift=pred_offsets[l + 1], axis=1)

        # Fused segment|nudge predictors (Dropout is identity in eval).
        kp = 2 + n_conv
        ph = jnp.maximum(
            jnp.dot(feat, w_ref[kp], preferred_element_type=jnp.float32)
            + b_ref[kp:kp + 1, :], 0.0)
        out_ref[...] = (jnp.dot(ph, w_ref[kp + 1], preferred_element_type=jnp.float32)
                        + b_ref[kp + 1:kp + 2, :])

    return kernel


# ------------------ one-off (graph / param static) packing ------------------

def pack_static(params, edge_index, n_users, n_segments, n_nudges):
    """Everything that does not depend on per-call node features, packed once."""
    E = params["fe_w2"].shape[1]
    F = params["fe_w1"].shape[0]
    n_nodes = n_users + n_segments + n_nudges
    conv_in = [l["w1"].shape[0] for l in params["convs"]]
    conv_out = [l["w1"].shape[1] for l in params["convs"]]
    chunk_dims = [E] + conv_out
    final_dim = sum(chunk_dims)
    n_heads = n_segments + n_nudges
    assert F <= LANES and 2 * E <= LANES and n_heads <= LANES
    assert final_dim <= LANES
    assert max(conv_in) * 3 <= LANES          # room for mirrored W2 rows

    # Graph-static: dense adjacency (dst x src, edge multiplicity) + in-degree.
    src, dst = edge_index[0], edge_index[1]
    adj = jnp.zeros((n_nodes, n_nodes), jnp.float32).at[dst, src].add(1.0)
    deg = jnp.sum(adj, axis=1, keepdims=True)

    # Node-static slab: plane 0 = fixed embeddings minus the constant encoder
    # output of an all-zero feature row (so enc + plane0 is exact for every
    # node), plane 1 = in-degree broadcast over lanes (avoids [N,1] lane math).
    c = jnp.dot(jnp.maximum(params["fe_b1"], 0.0), params["fe_w2"]) + params["fe_b2"]
    base = jnp.concatenate(
        [jnp.zeros((n_users, E), jnp.float32),
         params["segment_embed"] - c,
         params["nudge_embed"] - c], axis=0)
    node_static = jnp.zeros((2, n_nodes, LANES), jnp.float32)
    node_static = node_static.at[0, :, :E].set(base)
    node_static = node_static.at[1].set(jnp.broadcast_to(deg, (n_nodes, LANES)))

    # Weight slab [n_w, 128, 128] and bias slab [8, 128].
    n_w = 2 + len(params["convs"]) + 2
    w_slab = jnp.zeros((n_w, LANES, LANES), jnp.float32)
    b_slab = jnp.zeros((8, LANES), jnp.float32)

    # Feature encoder.
    w_slab = w_slab.at[0, :F, :E].set(params["fe_w1"])
    b_slab = b_slab.at[0, :E].set(params["fe_b1"][0])
    w_slab = w_slab.at[1, :E, :E].set(params["fe_w2"])
    b_slab = b_slab.at[1, :E].set(params["fe_b2"][0])

    # BiInteraction layers: fused [[W1],[W2]] plus a mirrored copy of W2 at
    # rows LANES-d_in:, so the layout is correct whichever direction the lane
    # rotate moves data (the unused copy only ever multiplies zero lanes).
    for i, layer in enumerate(params["convs"]):
        d_in, d_out = layer["w1"].shape
        w_slab = w_slab.at[2 + i, :d_in, :d_out].set(layer["w1"])
        w_slab = w_slab.at[2 + i, d_in:2 * d_in, :d_out].set(layer["w2"])
        w_slab = w_slab.at[2 + i, LANES - d_in:, :d_out].set(layer["w2"])
        b_slab = b_slab.at[2 + i, :d_out].set((layer["b1"] + layer["b2"])[0])

    # Fused predictor layer 1: column-concat seg|nudge W1, rows laid out to
    # match the lane positions of the in-kernel [x0|x1|x2] concat (mirrored
    # copies again for rotate-direction safety).
    kp = 2 + len(params["convs"])
    w1_cat = jnp.concatenate([params["seg_w1"], params["nud_w1"]], axis=1)
    b1_cat = jnp.concatenate([params["seg_b1"], params["nud_b1"]], axis=1)
    offs = [0]
    for d in chunk_dims[:-1]:
        offs.append(offs[-1] + d)
    spans = [(o, o + d) for o, d in zip(offs, chunk_dims)]
    for l, (o, d) in enumerate(zip(offs, chunk_dims)):
        chunk = w1_cat[o:o + d]
        w_slab = w_slab.at[kp, o:o + d, :2 * E].set(chunk)
        m = (LANES - o) % LANES
        if m != o:
            assert all(m + d <= s or m >= e
                       for j, (s, e) in enumerate(spans) if j != l), \
                "mirrored predictor rows collide with another chunk"
            w_slab = w_slab.at[kp, m:m + d, :2 * E].set(chunk)
    b_slab = b_slab.at[kp, :2 * E].set(b1_cat[0])

    # Fused (block-diagonal) predictor layer 2, output padded to 128 lanes.
    w_slab = w_slab.at[kp + 1, :E, :n_segments].set(params["seg_w2"])
    w_slab = w_slab.at[kp + 1, E:2 * E, n_segments:n_heads].set(params["nud_w2"])
    b_slab = b_slab.at[kp + 1, :n_segments].set(params["seg_b2"][0])
    b_slab = b_slab.at[kp + 1, n_segments:n_heads].set(params["nud_b2"][0])

    return dict(adj=adj, node_static=node_static, w_slab=w_slab, b_slab=b_slab,
                n_users=n_users, n_segments=n_segments, n_nudges=n_nudges,
                n_feature_types=F, embed_dim=E,
                conv_in_dims=tuple(conv_in), pred_offsets=tuple(offs))


# --------------------------------- wrapper -----------------------------------

def forward_predict(packed, x_feat):
    """Equivalent of PregnancyAppGNN_PyG._forward_predict, one pallas_call."""
    n_users = packed["n_users"]
    n_segments = packed["n_segments"]
    n_nudges = packed["n_nudges"]
    F = packed["n_feature_types"]
    n_nodes = packed["adj"].shape[0]

    # Per-call glue: only the user rows' features enter the model; pad them
    # into the lane-dense slab (non-user rows stay zero — see pack_static).
    x_slab = jnp.zeros((n_nodes, LANES), jnp.float32)
    x_slab = x_slab.at[:n_users, :F].set(x_feat[:n_users, :F])

    kernel = make_predict_kernel(n_users, packed["conv_in_dims"],
                                 packed["pred_offsets"])
    out = pl.pallas_call(
        kernel,
        out_shape=jax.ShapeDtypeStruct((n_users, LANES), jnp.float32),
        in_specs=[pl.BlockSpec(memory_space=pltpu.MemorySpace.VMEM)] * 5,
        out_specs=pl.BlockSpec(memory_space=pltpu.MemorySpace.VMEM),
    )(x_slab, packed["adj"], packed["node_static"], packed["w_slab"],
      packed["b_slab"])

    return out[:, :n_segments], out[:, n_segments:n_segments + n_nudges]


# --------------------------- parameter construction --------------------------

def xavier_uniform(key, fan_in, fan_out, shape):
    bound = (6.0 / (fan_in + fan_out)) ** 0.5
    return jax.random.uniform(key, shape, jnp.float32, -bound, bound)


def init_params(key, n_feature_types, embed_dim, n_segments, n_nudges, conv_dims):
    keys = iter(jax.random.split(key, 32))
    p = {}
    # feature_encoder: Linear(F, E) -> ReLU -> Linear(E, E); weights are [in, out]
    p["fe_w1"] = xavier_uniform(next(keys), n_feature_types, embed_dim,
                                (n_feature_types, embed_dim))
    p["fe_b1"] = jnp.zeros((1, embed_dim), jnp.float32)
    p["fe_w2"] = xavier_uniform(next(keys), embed_dim, embed_dim,
                                (embed_dim, embed_dim))
    p["fe_b2"] = jnp.zeros((1, embed_dim), jnp.float32)
    # embedding tables
    p["segment_embed"] = xavier_uniform(next(keys), n_segments, embed_dim,
                                        (n_segments, embed_dim))
    p["nudge_embed"] = xavier_uniform(next(keys), n_nudges, embed_dim,
                                      (n_nudges, embed_dim))
    # BiInteractionConv layers
    p["convs"] = []
    for d_in, d_out in zip(conv_dims[:-1], conv_dims[1:]):
        p["convs"].append({
            "w1": xavier_uniform(next(keys), d_in, d_out, (d_in, d_out)),
            "b1": jnp.zeros((1, d_out), jnp.float32),
            "w2": xavier_uniform(next(keys), d_in, d_out, (d_in, d_out)),
            "b2": jnp.zeros((1, d_out), jnp.float32),
        })
    final_dim = sum(conv_dims)
    # segment / nudge predictors
    p["seg_w1"] = xavier_uniform(next(keys), final_dim, embed_dim, (final_dim, embed_dim))
    p["seg_b1"] = jnp.zeros((1, embed_dim), jnp.float32)
    p["seg_w2"] = xavier_uniform(next(keys), embed_dim, n_segments, (embed_dim, n_segments))
    p["seg_b2"] = jnp.zeros((1, n_segments), jnp.float32)
    p["nud_w1"] = xavier_uniform(next(keys), final_dim, embed_dim, (final_dim, embed_dim))
    p["nud_b1"] = jnp.zeros((1, embed_dim), jnp.float32)
    p["nud_w2"] = xavier_uniform(next(keys), embed_dim, n_nudges, (embed_dim, n_nudges))
    p["nud_b2"] = jnp.zeros((1, n_nudges), jnp.float32)
    # feature_transform exists in __init__ but is unused in forward — omitted.
    return p


# ------------------------------ pure-JAX reference ---------------------------

def reference_predict(params, x_feat, edge_index, n_users, n_segments, n_nudges):
    n_nodes = n_users + n_segments + n_nudges
    src, dst = edge_index[0], edge_index[1]
    adj = jnp.zeros((n_nodes, n_nodes), jnp.float32).at[dst, src].add(1.0)
    deg = jnp.sum(adj, axis=1, keepdims=True)
    hi = jax.lax.Precision.HIGHEST

    uf = x_feat[:n_users]
    h = jnp.maximum(jnp.dot(uf, params["fe_w1"], precision=hi) + params["fe_b1"], 0.0)
    ue = jnp.dot(h, params["fe_w2"], precision=hi) + params["fe_b2"]
    x = jnp.concatenate([ue, params["segment_embed"], params["nudge_embed"]], 0)
    xs = [x]
    for layer in params["convs"]:
        ax = jnp.dot(adj, x, precision=hi)
        h = (jnp.dot(deg * x + ax, layer["w1"], precision=hi)
             + jnp.dot(x * ax, layer["w2"], precision=hi)
             + deg * (layer["b1"] + layer["b2"]))
        h = jnp.where(h > 0, h, 0.01 * h)
        nrm = jnp.sqrt(jnp.sum(h * h, axis=1, keepdims=True))
        x = h / jnp.maximum(nrm, 1e-12)
        xs.append(x)
    feat = jnp.concatenate(xs, axis=1)[:n_users]
    hs = jnp.maximum(jnp.dot(feat, params["seg_w1"], precision=hi) + params["seg_b1"], 0.0)
    seg = jnp.dot(hs, params["seg_w2"], precision=hi) + params["seg_b2"]
    hn = jnp.maximum(jnp.dot(feat, params["nud_w1"], precision=hi) + params["nud_b1"], 0.0)
    nud = jnp.dot(hn, params["nud_w2"], precision=hi) + params["nud_b2"]
    return seg, nud


# ---------------------------------- main -------------------------------------

if __name__ == "__main__":
    n_users, n_segments, n_nudges = 8, 4, 4
    n_feature_types, embed_dim = 8, 32
    conv_dims = [embed_dim, 32, 32]            # args.conv_dim_list = "[32, 32]"
    n_nodes = n_users + n_segments + n_nudges  # 16

    key = jax.random.PRNGKey(0)
    k_param, k_x = jax.random.split(key)
    params = init_params(k_param, n_feature_types, embed_dim,
                         n_segments, n_nudges, conv_dims)

    # data.x: node features (only the first n_users rows are used by the model).
    x_feat = jax.random.normal(k_x, (n_nodes, n_feature_types), jnp.float32)

    # Deterministic bipartite-ish edges: user <-> segment, user <-> nudge.
    users = jnp.arange(n_users)
    segs = n_users + (users % n_segments)
    nuds = n_users + n_segments + (users % n_nudges)
    src = jnp.concatenate([users, segs, users, nuds])
    dst = jnp.concatenate([segs, users, nuds, users])
    edge_index = jnp.stack([src, dst]).astype(jnp.int32)   # [2, 32]

    # Hoisted one-off packing of all graph/param-static data; the jitted
    # per-call path is just feature padding + the fused kernel + head split.
    packed = pack_static(params, edge_index, n_users, n_segments, n_nudges)
    predict = jax.jit(lambda xf: forward_predict(packed, xf))

    seg_preds, nud_preds = predict(x_feat)
    jax.block_until_ready((seg_preds, nud_preds))

    assert seg_preds.shape == (n_users, n_segments)
    assert nud_preds.shape == (n_users, n_nudges)

    seg_ref, nud_ref = reference_predict(
        params, x_feat, edge_index, n_users, n_segments, n_nudges)
    # f32 end-to-end now (no bf16 truncation); bound is loose only to absorb
    # per-chip differences in the MXU f32 pass count.
    assert jnp.allclose(seg_preds, seg_ref, atol=1e-2, rtol=1e-2)
    assert jnp.allclose(nud_preds, nud_ref, atol=1e-2, rtol=1e-2)

    print("KERNEL_OK")
</pallas_src>

<mosaic_0001>
module attributes {stable_mosaic.version = 11 : i64} {
  func.func @kernel(%arg0: memref<16x128xf32, #tpu.memory_space<vmem>>, %arg1: memref<16x16xf32, #tpu.memory_space<vmem>>, %arg2: memref<2x16x128xf32, #tpu.memory_space<vmem>>, %arg3: memref<6x128x128xf32, #tpu.memory_space<vmem>>, %arg4: memref<8x128xf32, #tpu.memory_space<vmem>>, %arg5: memref<8x128xf32, #tpu.memory_space<vmem>>) attributes {dimension_semantics = [], scalar_prefetch = 0 : i64, scratch_operands = 0 : i64, tpu.core_type = #tpu.core_type<tc>} {
    %c0 = arith.constant 0 : index
    %c0_0 = arith.constant 0 : index
    %0 = vector.load %arg1[%c0, %c0_0] : memref<16x16xf32, #tpu.memory_space<vmem>>, vector<16x16xf32>
    %c0_1 = arith.constant 0 : index
    %c0_2 = arith.constant 0 : index
    %c0_3 = arith.constant 0 : index
    %1 = vector.load %arg2[%c0_1, %c0_2, %c0_3] : memref<2x16x128xf32, #tpu.memory_space<vmem>>, vector<1x16x128xf32>
    %2 = vector.shape_cast %1 : vector<1x16x128xf32> to vector<16x128xf32>
    %c1 = arith.constant 1 : index
    %c0_4 = arith.constant 0 : index
    %c0_5 = arith.constant 0 : index
    %3 = vector.load %arg2[%c1, %c0_4, %c0_5] : memref<2x16x128xf32, #tpu.memory_space<vmem>>, vector<1x16x128xf32>
    %4 = vector.shape_cast %3 : vector<1x16x128xf32> to vector<16x128xf32>
    %c0_6 = arith.constant 0 : index
    %c0_7 = arith.constant 0 : index
    %5 = vector.load %arg0[%c0_6, %c0_7] : memref<16x128xf32, #tpu.memory_space<vmem>>, vector<16x128xf32>
    %c0_8 = arith.constant 0 : index
    %c0_9 = arith.constant 0 : index
    %c0_10 = arith.constant 0 : index
    %6 = vector.load %arg3[%c0_8, %c0_9, %c0_10] : memref<6x128x128xf32, #tpu.memory_space<vmem>>, vector<1x128x128xf32>
    %7 = vector.shape_cast %6 : vector<1x128x128xf32> to vector<128x128xf32>
    %cst = arith.constant dense<0.000000e+00> : vector<16x128xf32>
    %8 = tpu.matmul %5, %7, %cst {dimension_numbers = #tpu.dot_dimension_numbers<[1], [0], [0], [1], [0, 0, 1, 1], [], []>} : vector<16x128xf32>, vector<128x128xf32>, vector<16x128xf32> -> vector<16x128xf32>
    %c0_11 = arith.constant 0 : index
    %c0_12 = arith.constant 0 : index
    %9 = vector.load %arg4[%c0_11, %c0_12] : memref<8x128xf32, #tpu.memory_space<vmem>>, vector<1x128xf32>
    %10 = vector.broadcast %9 : vector<1x128xf32> to vector<16x128xf32>
    %11 = arith.addf %8, %10 : vector<16x128xf32>
    %cst_13 = arith.constant 0.000000e+00 : f32
    %12 = vector.broadcast %cst_13 : f32 to vector<16x128xf32>
    %13 = arith.maximumf %11, %12 : vector<16x128xf32>
    %c1_14 = arith.constant 1 : index
    %c0_15 = arith.constant 0 : index
    %c0_16 = arith.constant 0 : index
    %14 = vector.load %arg3[%c1_14, %c0_15, %c0_16] : memref<6x128x128xf32, #tpu.memory_space<vmem>>, vector<1x128x128xf32>
    %15 = vector.shape_cast %14 : vector<1x128x128xf32> to vector<128x128xf32>
    %cst_17 = arith.constant dense<0.000000e+00> : vector<16x128xf32>
    %16 = tpu.matmul %13, %15, %cst_17 {dimension_numbers = #tpu.dot_dimension_numbers<[1], [0], [0], [1], [0, 0, 1, 1], [], []>} : vector<16x128xf32>, vector<128x128xf32>, vector<16x128xf32> -> vector<16x128xf32>
    %c1_18 = arith.constant 1 : index
    %c0_19 = arith.constant 0 : index
    %17 = vector.load %arg4[%c1_18, %c0_19] : memref<8x128xf32, #tpu.memory_space<vmem>>, vector<1x128xf32>
    %18 = vector.broadcast %17 : vector<1x128xf32> to vector<16x128xf32>
    %19 = arith.addf %16, %18 : vector<16x128xf32>
    %20 = arith.addf %19, %2 : vector<16x128xf32>
    %21 = vector.extract_strided_slice %20 {offsets = [0, 0], sizes = [8, 128], strides = [1, 1]} : vector<16x128xf32> to vector<8x128xf32>
    %cst_20 = arith.constant dense<0.000000e+00> : vector<16x128xf32>
    %22 = tpu.matmul %0, %20, %cst_20 {dimension_numbers = #tpu.dot_dimension_numbers<[1], [0], [0], [1], [0, 0, 1, 1], [], []>} : vector<16x16xf32>, vector<16x128xf32>, vector<16x128xf32> -> vector<16x128xf32>
    %23 = arith.mulf %4, %20 : vector<16x128xf32>
    %24 = arith.addf %23, %22 : vector<16x128xf32>
    %25 = arith.mulf %20, %22 : vector<16x128xf32>
    %c32_i32 = arith.constant 32 : i32
    %26 = tpu.dynamic_rotate %25 by %c32_i32 dim 1 : vector<16x128xf32>, i32 -> vector<16x128xf32>
    %27 = arith.addf %24, %26 : vector<16x128xf32>
    %c2 = arith.constant 2 : index
    %c0_21 = arith.constant 0 : index
    %c0_22 = arith.constant 0 : index
    %28 = vector.load %arg3[%c2, %c0_21, %c0_22] : memref<6x128x128xf32, #tpu.memory_space<vmem>>, vector<1x128x128xf32>
    %29 = vector.shape_cast %28 : vector<1x128x128xf32> to vector<128x128xf32>
    %cst_23 = arith.constant dense<0.000000e+00> : vector<16x128xf32>
    %30 = tpu.matmul %27, %29, %cst_23 {dimension_numbers = #tpu.dot_dimension_numbers<[1], [0], [0], [1], [0, 0, 1, 1], [], []>} : vector<16x128xf32>, vector<128x128xf32>, vector<16x128xf32> -> vector<16x128xf32>
    %c2_24 = arith.constant 2 : index
    %c0_25 = arith.constant 0 : index
    %31 = vector.load %arg4[%c2_24, %c0_25] : memref<8x128xf32, #tpu.memory_space<vmem>>, vector<1x128xf32>
    %32 = vector.broadcast %31 : vector<1x128xf32> to vector<16x128xf32>
    %33 = arith.mulf %4, %32 : vector<16x128xf32>
    %34 = arith.addf %30, %33 : vector<16x128xf32>
    %cst_26 = arith.constant 0.00999999977 : f32
    %35 = vector.broadcast %cst_26 : f32 to vector<16x128xf32>
    %36 = arith.mulf %35, %34 : vector<16x128xf32>
    %37 = arith.maximumf %34, %36 : vector<16x128xf32>
    %38 = arith.mulf %37, %37 : vector<16x128xf32>
    %cst_27 = arith.constant dense<0.000000e+00> : vector<16xf32>
    %39 = vector.multi_reduction <add>, %38, %cst_27 [1] : vector<16x128xf32> to vector<16xf32>
    %40 = vector.shape_cast %39 : vector<16xf32> to vector<16x1xf32>
    %cst_28 = arith.constant 1.000000e-24 : f32
    %41 = vector.broadcast %cst_28 : f32 to vector<16x1xf32>
    %42 = arith.maximumf %40, %41 : vector<16x1xf32>
    %43 = math.rsqrt %42 : vector<16x1xf32>
    %44 = vector.broadcast %43 : vector<16x1xf32> to vector<16x128xf32>
    %45 = arith.mulf %37, %44 : vector<16x128xf32>
    %46 = vector.extract_strided_slice %45 {offsets = [0, 0], sizes = [8, 128], strides = [1, 1]} : vector<16x128xf32> to vector<8x128xf32>
    %c32_i32_29 = arith.constant 32 : i32
    %47 = tpu.dynamic_rotate %46 by %c32_i32_29 dim 1 : vector<8x128xf32>, i32 -> vector<8x128xf32>
    %48 = arith.addf %21, %47 : vector<8x128xf32>
    %cst_30 = arith.constant dense<0.000000e+00> : vector<16x128xf32>
    %49 = tpu.matmul %0, %45, %cst_30 {dimension_numbers = #tpu.dot_dimension_numbers<[1], [0], [0], [1], [0, 0, 1, 1], [], []>} : vector<16x16xf32>, vector<16x128xf32>, vector<16x128xf32> -> vector<16x128xf32>
    %50 = arith.mulf %4, %45 : vector<16x128xf32>
    %51 = arith.addf %50, %49 : vector<16x128xf32>
    %52 = arith.mulf %45, %49 : vector<16x128xf32>
    %c32_i32_31 = arith.constant 32 : i32
    %53 = tpu.dynamic_rotate %52 by %c32_i32_31 dim 1 : vector<16x128xf32>, i32 -> vector<16x128xf32>
    %54 = arith.addf %51, %53 : vector<16x128xf32>
    %c3 = arith.constant 3 : index
    %c0_32 = arith.constant 0 : index
    %c0_33 = arith.constant 0 : index
    %55 = vector.load %arg3[%c3, %c0_32, %c0_33] : memref<6x128x128xf32, #tpu.memory_space<vmem>>, vector<1x128x128xf32>
    %56 = vector.shape_cast %55 : vector<1x128x128xf32> to vector<128x128xf32>
    %cst_34 = arith.constant dense<0.000000e+00> : vector<16x128xf32>
    %57 = tpu.matmul %54, %56, %cst_34 {dimension_numbers = #tpu.dot_dimension_numbers<[1], [0], [0], [1], [0, 0, 1, 1], [], []>} : vector<16x128xf32>, vector<128x128xf32>, vector<16x128xf32> -> vector<16x128xf32>
    %c3_35 = arith.constant 3 : index
    %c0_36 = arith.constant 0 : index
    %58 = vector.load %arg4[%c3_35, %c0_36] : memref<8x128xf32, #tpu.memory_space<vmem>>, vector<1x128xf32>
    %59 = vector.broadcast %58 : vector<1x128xf32> to vector<16x128xf32>
    %60 = arith.mulf %4, %59 : vector<16x128xf32>
    %61 = arith.addf %57, %60 : vector<16x128xf32>
    %cst_37 = arith.constant 0.00999999977 : f32
    %62 = vector.broadcast %cst_37 : f32 to vector<16x128xf32>
    %63 = arith.mulf %62, %61 : vector<16x128xf32>
    %64 = arith.maximumf %61, %63 : vector<16x128xf32>
    %65 = arith.mulf %64, %64 : vector<16x128xf32>
    %cst_38 = arith.constant dense<0.000000e+00> : vector<16xf32>
    %66 = vector.multi_reduction <add>, %65, %cst_38 [1] : vector<16x128xf32> to vector<16xf32>
    %67 = vector.shape_cast %66 : vector<16xf32> to vector<16x1xf32>
    %cst_39 = arith.constant 1.000000e-24 : f32
    %68 = vector.broadcast %cst_39 : f32 to vector<16x1xf32>
    %69 = arith.maximumf %67, %68 : vector<16x1xf32>
    %70 = math.rsqrt %69 : vector<16x1xf32>
    %71 = vector.broadcast %70 : vector<16x1xf32> to vector<16x128xf32>
    %72 = arith.mulf %64, %71 : vector<16x128xf32>
    %73 = vector.extract_strided_slice %72 {offsets = [0, 0], sizes = [8, 128], strides = [1, 1]} : vector<16x128xf32> to vector<8x128xf32>
    %c64_i32 = arith.constant 64 : i32
    %74 = tpu.dynamic_rotate %73 by %c64_i32 dim 1 : vector<8x128xf32>, i32 -> vector<8x128xf32>
    %75 = arith.addf %48, %74 : vector<8x128xf32>
    %c4 = arith.constant 4 : index
    %c0_40 = arith.constant 0 : index
    %c0_41 = arith.constant 0 : index
    %76 = vector.load %arg3[%c4, %c0_40, %c0_41] : memref<6x128x128xf32, #tpu.memory_space<vmem>>, vector<1x128x128xf32>
    %77 = vector.shape_cast %76 : vector<1x128x128xf32> to vector<128x128xf32>
    %cst_42 = arith.constant dense<0.000000e+00> : vector<8x128xf32>
    %78 = tpu.matmul %75, %77, %cst_42 {dimension_numbers = #tpu.dot_dimension_numbers<[1], [0], [0], [1], [0, 0, 1, 1], [], []>} : vector<8x128xf32>, vector<128x128xf32>, vector<8x128xf32> -> vector<8x128xf32>
    %c4_43 = arith.constant 4 : index
    %c0_44 = arith.constant 0 : index
    %79 = vector.load %arg4[%c4_43, %c0_44] : memref<8x128xf32, #tpu.memory_space<vmem>>, vector<1x128xf32>
    %80 = vector.broadcast %79 : vector<1x128xf32> to vector<8x128xf32>
    %81 = arith.addf %78, %80 : vector<8x128xf32>
    %cst_45 = arith.constant 0.000000e+00 : f32
    %82 = vector.broadcast %cst_45 : f32 to vector<8x128xf32>
    %83 = arith.maximumf %81, %82 : vector<8x128xf32>
    %c5 = arith.constant 5 : index
    %c0_46 = arith.constant 0 : index
    %c0_47 = arith.constant 0 : index
    %84 = vector.load %arg3[%c5, %c0_46, %c0_47] : memref<6x128x128xf32, #tpu.memory_space<vmem>>, vector<1x128x128xf32>
    %85 = vector.shape_cast %84 : vector<1x128x128xf32> to vector<128x128xf32>
    %cst_48 = arith.constant dense<0.000000e+00> : vector<8x128xf32>
    %86 = tpu.matmul %83, %85, %cst_48 {dimension_numbers = #tpu.dot_dimension_numbers<[1], [0], [0], [1], [0, 0, 1, 1], [], []>} : vector<8x128xf32>, vector<128x128xf32>, vector<8x128xf32> -> vector<8x128xf32>
    %c5_49 = arith.constant 5 : index
    %c0_50 = arith.constant 0 : index
    %87 = vector.load %arg4[%c5_49, %c0_50] : memref<8x128xf32, #tpu.memory_space<vmem>>, vector<1x128xf32>
    %88 = vector.broadcast %87 : vector<1x128xf32> to vector<8x128xf32>
    %89 = arith.addf %86, %88 : vector<8x128xf32>
    %c0_51 = arith.constant 0 : index
    %c0_52 = arith.constant 0 : index
    %90 = vector.load %arg5[%c0_51, %c0_52] : memref<8x128xf32, #tpu.memory_space<vmem>>, vector<8x128xf32>
    tpu.vector_store %arg5[%c0_51, %c0_52], %89 {strides = array<i32>} : memref<8x128xf32, #tpu.memory_space<vmem>>, vector<8x128xf32>,
    return
  }
}

</mosaic_0001>

<bundles_post_ra>
// kernel: _lambda_.1
= control target key start
LH: loop header
LB: loop body
LE: loop exit
PB: predicated region body
PF: predicated region fallthrough
CT: control target
= control target key end

     0   :  { %10 = vsyncpa [#allocation3], 0  ;;  %s1223_s18 = smov [#allocation2]   ;;  %s1390_s0 = inlined_call_operand.vmem [shape: f32[16,128], index: 0, kind: input, shape index: {}]   ;;  %s1391_s1 = inlined_call_operand.vmem [shape: f32[16,16], index: 1, kind: input, shape index: {}]   ;;  %s1392_s2 = inlined_call_operand.vmem [shape: f32[2,16,128], index: 2, kind: input, shape index: {}]   ;;  %s1393_s3 = inlined_call_operand.hbm [shape: f32[6,128,128], index: 3, kind: input, shape index: {}]   ;;  %s1394_s4 = inlined_call_operand.vmem [shape: f32[8,128], index: 4, kind: input, shape index: {}]   ;;  %s1395_s5 = inlined_call_operand.vmem [shape: f32[8,128], index: 5, kind: output, shape index: {}]  }
   0x1   :  { %s22_s19 = sshll.u32 %s1223_s18, 4  ;;  %s23_s19 = int_to_ptr.vmem [resolvable:$true] %s22_s19 }
   0x2   :  { %s1209_s20 = scalar_lea.vmem %s23_s19, 12288  ;;  %p1214_p1 = scmp.lt.s32.totalorder %s23_s19, %s23_s19 }
   0x3   :  { %p1210_p0 = scmp.ne.s32.totalorder %s23_s19, %s1209_s20  ;;  %p1215_p2 = scmp.lt.s32.totalorder %s1209_s20, %s1209_s20 }
   0x5   :  { %p1216_p3 = por %p1215_p2, %p1214_p1 }
   0x7   :  { %p1217_p4 = pnand %p1216_p3, %p1210_p0 }
   0x9   :  { %1220 = shalt.err (!%p1217_p4)
}
   0xa   :  { %s1224_s21 = smov 128   ;;  %s1225_s22 = smov 8  }
   0xb   :  { %28 = dma.hbm_to_vmem [thread:$0]  %s1393_s3, 12288, %s23_s19, [#allocation3], %s1224_s21, %s1224_s21, %s1225_s22  }
   0xc   :  { %1221 = dma.done.wait [#allocation3], 12288  }
   0xd   :  { %1222 = vsyncadd [#allocation3], 4294955008  ;;  %v58_v0 = vld [vmem:[#allocation2 + $0x78] sm:$0xff]  ;;  %v57_v1 = vld [vmem:[#allocation2 + $0x70] sm:$0xff]  ;;  %vm240_vm0 = vcmask 130048   ;;  %vm1228_vm1 = vmmov 0  }
   0xe   :  { %964 = vmatprep.subr.mxu0 %v58_v0  ;;  %v56_v2 = vld [vmem:[#allocation2 + $0x68] sm:$0xff]  ;;  %v55_v3 = vld [vmem:[#allocation2 + $0x60] sm:$0xff]  ;;  %v54_v5 = vld [vmem:[#allocation2 + $0x58] sm:$0xff]  ;;  %s1229_s21 = smov 64  }
   0xf   :  { %965 = vmatpush3.msra.mxu0 %v58_v0  ;;  %v41_v4 = vld [vmem:[%s1390_s0] sm:$0xff]  ;;  %v157_v6 = vld [vmem:[#allocation2 + $0xf8] sm:$0xff]  ;;  %v156_v7 = vld [vmem:[#allocation2 + $0xf0] sm:$0xff] }
  0x10   :  { %966 = vmatprep.subr.mxu0 %v57_v1  ;;  %996 = vmatprep.mubr.f32.mxu0 %v41_v4  ;;  %v53_v8 = vld [vmem:[#allocation2 + $0x50] sm:$0xff]  ;;  %v155_v9 = vld [vmem:[#allocation2 + $0xe8] sm:$0xff]  ;;  %v154_v11 = vld [vmem:[#allocation2 + $0xe0] sm:$0xff] }
  0x11   :  { %967 = vmatpush3.msra.mxu0 %v57_v1  ;;  %999 = vmatprep.subr.mxu1 %v157_v6  ;;  %v52_v10 = vld [vmem:[#allocation2 + $0x48] sm:$0xff]  ;;  %v51_v12 = vld [vmem:[#allocation2 + $0x40] sm:$0xff]  ;;  %v153_v13 = vld [vmem:[#allocation2 + $0xd8] sm:$0xff] }
  0x12   :  { %968 = vmatprep.subr.mxu0 %v56_v2  ;;  %1000 = vmatpush3.msra.mxu1 %v157_v6  ;;  %v50_v14 = vld [vmem:[#allocation2 + $0x38] sm:$0xff]  ;;  %v152_v15 = vld [vmem:[#allocation2 + $0xd0] sm:$0xff]  ;;  %v151_v17 = vld [vmem:[#allocation2 + $0xc8] sm:$0xff] }
  0x13   :  { %969 = vmatpush3.msra.mxu0 %v56_v2  ;;  %1001 = vmatprep.subr.mxu1 %v156_v7  ;;  %v49_v16 = vld [vmem:[#allocation2 + $0x30] sm:$0xff]  ;;  %v48_v18 = vld [vmem:[#allocation2 + $0x28] sm:$0xff]  ;;  %v150_v19 = vld [vmem:[#allocation2 + $0xc0] sm:$0xff] }
  0x14   :  { %970 = vmatprep.subr.mxu0 %v55_v3  ;;  %1002 = vmatpush3.msra.mxu1 %v156_v7  ;;  %v47_v20 = vld [vmem:[#allocation2 + $0x20] sm:$0xff]  ;;  %v149_v21 = vld [vmem:[#allocation2 + $0xb8] sm:$0xff]  ;;  %v148_v23 = vld [vmem:[#allocation2 + $0xb0] sm:$0xff] }
  0x15   :  { %971 = vmatpush3.msra.mxu0 %v55_v3  ;;  %1003 = vmatprep.subr.mxu1 %v155_v9  ;;  %v46_v22 = vld [vmem:[#allocation2 + $0x18] sm:$0xff]  ;;  %v45_v24 = vld [vmem:[#allocation2 + $0x10] sm:$0xff]  ;;  %v147_v25 = vld [vmem:[#allocation2 + $0xa8] sm:$0xff] }
  0x16   :  { %972 = vmatprep.subr.mxu0 %v54_v5  ;;  %1004 = vmatpush3.msra.mxu1 %v155_v9  ;;  %v44_v26 = vld [vmem:[#allocation2 + $0x8] sm:$0xff]  ;;  %v146_v27 = vld [vmem:[#allocation2 + $0xa0] sm:$0xff]  ;;  %v145_v30 = vld [vmem:[#allocation2 + $0x98] sm:$0xff] }
  0x17   :  { %973 = vmatpush3.msra.mxu0 %v54_v5  ;;  %1005 = vmatprep.subr.mxu1 %v154_v11  ;;  %v43_v28 = vld [vmem:[#allocation2] sm:$0xff]  ;;  %v42_v29 = vld [vmem:[%s1390_s0 + $0x8] sm:$0xff]  ;;  %v144_v31 = vld [vmem:[#allocation2 + $0x90] sm:$0xff] }
  0x18   :  { %974 = vmatprep.subr.mxu0 %v53_v8  ;;  %1006 = vmatpush3.msra.mxu1 %v154_v11  ;;  %v143_v32 = vld [vmem:[#allocation2 + $0x88] sm:$0xff]  ;;  %v142_v33 = vld [vmem:[#allocation2 + $0x80] sm:$0xff]  ;;  %v350_v52 = vld [vmem:[#allocation2 + $0x178] sm:$0xff] }
  0x19   :  { %975 = vmatpush3.msra.mxu0 %v53_v8  ;;  %1007 = vmatprep.subr.mxu1 %v153_v13  ;;  %v840_v34 = vld [vmem:[%s1394_s4] ss:$0 sm:$0xff]  ;;  %v841_v42 = vld [vmem:[%s1394_s4 + $0x1] ss:$0 sm:$0xff]  ;;  %v37_v43 = vld [vmem:[%s1392_s2 + $0x8] sm:$0xff] }
  0x1a   :  { %976 = vmatprep.subr.mxu0 %v52_v10  ;;  %1008 = vmatpush3.msra.mxu1 %v153_v13  ;;  %v34_v41 = vld [vmem:[%s1391_s1] sm:$0xff]  ;;  %v1295_v51 = vld [vmem:[%s1391_s1 + $0x8] sm:$0xff]  ;;  %v349_v53 = vld [vmem:[#allocation2 + $0x170] sm:$0xff]  ;;  %s1226_s1 = smov 32  }
  0x1b   :  { %977 = vmatpush3.msra.mxu0 %v52_v10  ;;  %1009 = vmatprep.subr.mxu1 %v152_v15  ;;  %v36_v46 = vld [vmem:[%s1392_s2] sm:$0xff]  ;;  %v348_v54 = vld [vmem:[#allocation2 + $0x168] sm:$0xff]  ;;  %v346_v56 = vld [vmem:[#allocation2 + $0x158] sm:$0xff] }
  0x1c   :  { %978 = vmatprep.subr.mxu0 %v51_v12  ;;  %1010 = vmatpush3.msra.mxu1 %v152_v15  ;;  %v347_v55 = vld [vmem:[#allocation2 + $0x160] sm:$0xff]  ;;  %v345_v57 = vld [vmem:[#allocation2 + $0x150] sm:$0xff]  ;;  %v344_v58 = vld [vmem:[#allocation2 + $0x148] sm:$0xff] }
  0x1d   :  { %979 = vmatpush3.msra.mxu0 %v51_v12  ;;  %1011 = vmatprep.subr.mxu1 %v151_v17  ;;  %v343_v59 = vld [vmem:[#allocation2 + $0x140] sm:$0xff]  ;;  %v342_v60 = vld [vmem:[#allocation2 + $0x138] sm:$0xff]  ;;  %v341_v61 = vld [vmem:[#allocation2 + $0x130] sm:$0xff] }
  0x1e   :  { %980 = vmatprep.subr.mxu0 %v50_v14  ;;  %1012 = vmatpush3.msra.mxu1 %v151_v17  ;;  %v340_v62 = vld [vmem:[#allocation2 + $0x128] sm:$0xff]  ;;  %v339_v63 = vld [vmem:[#allocation2 + $0x120] sm:$0xff]  ;;  %v338_v0 = vld [vmem:[#allocation2 + $0x118] sm:$0xff] }
  0x1f   :  { %981 = vmatpush3.msra.mxu0 %v50_v14  ;;  %1013 = vmatprep.subr.mxu1 %v150_v19  ;;  %v337_v1 = vld [vmem:[#allocation2 + $0x110] sm:$0xff]  ;;  %v336_v2 = vld [vmem:[#allocation2 + $0x108] sm:$0xff]  ;;  %v335_v3 = vld [vmem:[#allocation2 + $0x100] sm:$0xff] }
  0x20   :  { %982 = vmatprep.subr.mxu0 %v49_v16  ;;  %1014 = vmatpush3.msra.mxu1 %v150_v19  ;;  %v1308_v8 = vld [vmem:[%s1392_s2 + $0x10] sm:$0xff]  ;;  %v1315_v10 = vld [vmem:[%s1392_s2 + $0x18] sm:$0xff] }
  0x21   :  { %983 = vmatpush3.msra.mxu0 %v49_v16  ;;  %1015 = vmatprep.subr.mxu1 %v149_v21 }
  0x22   :  { %984 = vmatprep.subr.mxu0 %v48_v18  ;;  %1016 = vmatpush3.msra.mxu1 %v149_v21 }
  0x23   :  { %985 = vmatpush3.msra.mxu0 %v48_v18  ;;  %1017 = vmatprep.subr.mxu1 %v148_v23  ;;  %v844_v18 = vld [vmem:[%s1394_s4 + $0x2] ss:$0 sm:$0xff] }
  0x24   :  { %986 = vmatprep.subr.mxu0 %v47_v20  ;;  %1018 = vmatpush3.msra.mxu1 %v148_v23  ;;  %v357_v19 = vmul.f32 %v844_v18, %v1315_v10 }
  0x25   :  { %987 = vmatpush3.msra.mxu0 %v47_v20  ;;  %1019 = vmatprep.subr.mxu1 %v147_v25  ;;  %v356_v20 = vmul.f32 %v844_v18, %v1308_v8  ;;  %v658_v18 = vld [vmem:[#allocation2 + $0x250] sm:$0xff] }
  0x26   :  { %988 = vmatprep.subr.mxu0 %v46_v22  ;;  %1020 = vmatpush3.msra.mxu1 %v147_v25 }
  0x27   :  { %989 = vmatpush3.msra.mxu0 %v46_v22  ;;  %1021 = vmatprep.subr.mxu1 %v146_v27 }
  0x28   :  { %990 = vmatprep.subr.mxu0 %v45_v24  ;;  %1022 = vmatpush3.msra.mxu1 %v146_v27 }
  0x29   :  { %991 = vmatpush3.msra.mxu0 %v45_v24  ;;  %1023 = vmatprep.subr.mxu1 %v145_v30 }
  0x2a   :  { %992 = vmatprep.subr.mxu0 %v44_v26  ;;  %1024 = vmatpush3.msra.mxu1 %v145_v30 }
  0x2b   :  { %993 = vmatpush3.msra.mxu0 %v44_v26  ;;  %1025 = vmatprep.subr.mxu1 %v144_v31 }
  0x2c   :  { %994 = vmatprep.subr.mxu0 %v43_v28  ;;  %1026 = vmatpush3.msra.mxu1 %v144_v31 }
  0x2d   :  { %995 = vmatpush3.msra.mxu0 %v43_v28  ;;  %1027 = vmatprep.subr.mxu1 %v143_v32 }
  0x2e   :  { %997 = vmatmul.mubr.f32.vlgmr.msra.gmra.mxu0 %v42_v29  ;;  %1028 = vmatpush3.msra.mxu1 %v143_v32 }
  0x2f   :  { %1029 = vmatprep.subr.mxu1 %v142_v33  ;;  %1080 = vmatprep.mubr.msk.f32.mxu0 %vm240_vm0, %v34_v41 }
  0x30   :  { %1030 = vmatpush3.msra.mxu1 %v142_v33 }
  0xee   :  { %v998_v35 = vpop.f32.mrf.mxu0 }
  0xef   :  { %v136_v36 = vadd.f32 %v998_v35, %v840_v34 }
  0xf0   :  { %v130_v37 = vpop.f32.mrf.mxu0 }
  0xf1   :  { %v131_v38 = vadd.f32 %v840_v34, %v130_v37  ;;  %v140_v40 = vmax.f32 %v136_v36, 0.0 }
  0xf3   :  { %v139_v39 = vmax.f32 %v131_v38, 0.0 }
  0xf5   :  { %1031 = vmatprep.mubr.f32.mxu1 %v139_v39  ;;  %v555_v39 = vld [vmem:[#allocation2 + $0x1f8] sm:$0xff] }
  0xf6   :  { %1032 = vmatmul.mubr.f32.vlgmr.msra.gmra.mxu1 %v140_v40  ;;  %v554_v40 = vld [vmem:[#allocation2 + $0x1f0] sm:$0xff] }
  0xf7   :  { %1038 = vmatprep.mubr.msk.f32.mxu1 %vm240_vm0, %v34_v41  ;;  %v553_v41 = vld [vmem:[#allocation2 + $0x1e8] sm:$0xff] }
 0x1b6   :  { %v1033_v44 = vpop.f32.mrf.mxu1 }
 0x1b7   :  { %v235_v45 = vadd.f32 %v1033_v44, %v841_v42  ;;  %v550_v44 = vld [vmem:[#allocation2 + $0x1d0] sm:$0xff] }
 0x1b8   :  { %v229_v47 = vpop.f32.mrf.mxu1 }
 0x1b9   :  { %v1286_v48 = vadd.f32 %v235_v45, %v37_v43  ;;  %v230_v49 = vadd.f32 %v841_v42, %v229_v47  ;;  %v552_v42 = vld [vmem:[#allocation2 + $0x1e0] sm:$0xff]  ;;  %v551_v43 = vld [vmem:[#allocation2 + $0x1d8] sm:$0xff]  ;;  %v549_v45 = vld [vmem:[#allocation2 + $0x1c8] sm:$0xff] }
 0x1ba   :  { %v547_v47 = vld [vmem:[#allocation2 + $0x1b8] sm:$0xff] }
 0x1bb   :  { %v1288_v50 = vadd.f32 %v230_v49, %v36_v46  ;;  %1034 = vmatprep.subr.mxu1 %v1286_v48  ;;  %v323_v13 = vmul.f32 %v1315_v10, %v1286_v48  ;;  %v548_v46 = vld [vmem:[#allocation2 + $0x1c0] sm:$0xff]  ;;  %v545_v49 = vld [vmem:[#allocation2 + $0x1a8] sm:$0xff] }
 0x1bc   :  { %1035 = vmatpush3.msra.mxu1 %v1286_v48 }
 0x1bd   :  { %1036 = vmatprep.subr.mxu1 %v1288_v50  ;;  %v322_v9 = vmul.f32 %v1308_v8, %v1288_v50 }
 0x1be   :  { %1037 = vmatpush3.msra.mxu1 %v1288_v50 }
 0x1bf   :  { %1039 = vmatmul.mubr.msk.f32.vlgmr.msra.gmra.mxu1 %vm240_vm0, %v1295_v51  ;;  %1041 = vmatprep.subr.mxu1 %v350_v52 }
 0x1c0   :  { %1042 = vmatpush3.msra.mxu1 %v350_v52  ;;  %v543_v52 = vld [vmem:[#allocation2 + $0x198] sm:$0xff] }
 0x1c1   :  { %1043 = vmatprep.subr.mxu1 %v349_v53 }
 0x1c2   :  { %1044 = vmatpush3.msra.mxu1 %v349_v53  ;;  %v542_v53 = vld [vmem:[#allocation2 + $0x190] sm:$0xff] }
 0x1c3   :  { %1045 = vmatprep.subr.mxu1 %v348_v54 }
 0x1c4   :  { %1046 = vmatpush3.msra.mxu1 %v348_v54  ;;  %v541_v54 = vld [vmem:[#allocation2 + $0x188] sm:$0xff] }
 0x1c5   :  { %1047 = vmatprep.subr.mxu1 %v347_v55 }
 0x1c6   :  { %1048 = vmatpush3.msra.mxu1 %v347_v55  ;;  %v540_v55 = vld [vmem:[#allocation2 + $0x180] sm:$0xff] }
 0x1c7   :  { %1049 = vmatprep.subr.mxu1 %v346_v56 }
 0x1c8   :  { %1050 = vmatpush3.msra.mxu1 %v346_v56 }
 0x1c9   :  { %1051 = vmatprep.subr.mxu1 %v345_v57 }
 0x1ca   :  { %1052 = vmatpush3.msra.mxu1 %v345_v57 }
 0x1cb   :  { %1053 = vmatprep.subr.mxu1 %v344_v58 }
 0x1cc   :  { %1054 = vmatpush3.msra.mxu1 %v344_v58 }
 0x1cd   :  { %1055 = vmatprep.subr.mxu1 %v343_v59 }
 0x1ce   :  { %1056 = vmatpush3.msra.mxu1 %v343_v59 }
 0x1cf   :  { %1057 = vmatprep.subr.mxu1 %v342_v60 }
 0x1d0   :  { %1058 = vmatpush3.msra.mxu1 %v342_v60 }
 0x1d1   :  { %1059 = vmatprep.subr.mxu1 %v341_v61 }
 0x1d2   :  { %1060 = vmatpush3.msra.mxu1 %v341_v61 }
 0x1d3   :  { %1061 = vmatprep.subr.mxu1 %v340_v62 }
 0x1d4   :  { %1062 = vmatpush3.msra.mxu1 %v340_v62 }
 0x1d5   :  { %1063 = vmatprep.subr.mxu1 %v339_v63 }
 0x1d6   :  { %1064 = vmatpush3.msra.mxu1 %v339_v63 }
 0x1d7   :  { %1065 = vmatprep.subr.mxu1 %v338_v0 }
 0x1d8   :  { %1066 = vmatpush3.msra.mxu1 %v338_v0 }
 0x1d9   :  { %1067 = vmatprep.subr.mxu1 %v337_v1 }
 0x1da   :  { %1068 = vmatpush3.msra.mxu1 %v337_v1 }
 0x1db   :  { %1069 = vmatprep.subr.mxu1 %v336_v2 }
 0x1dc   :  { %1070 = vmatpush3.msra.mxu1 %v336_v2 }
 0x1dd   :  { %1071 = vmatprep.subr.mxu1 %v335_v3 }
 0x1de   :  { %1072 = vmatpush3.msra.mxu1 %v335_v3 }
 0x27f   :  { %v1040_v4 = vpop.f32.mrf.mxu1 }
 0x280   :  { %v327_v7 = vmul.f32 %v1040_v4, %v1286_v48  ;;  %v325_v15 = vadd.f32 %v1040_v4, %v323_v13  ;;  %v546_v48 = vld [vmem:[#allocation2 + $0x1b0] sm:$0xff]  ;;  %v847_v4 = vld [vmem:[%s1394_s4 + $0x3] ss:$0 sm:$0xff]  ;;  %v663_v13 = vld [vmem:[#allocation2 + $0x278] sm:$0xff] }
 0x281   :  { %v313_v5 = vpop.f32.mrf.mxu1 }
 0x282   :  { %v326_v6 = vmul.f32 %v313_v5, %v1288_v50  ;;  %v324_v11 = vadd.f32 %v322_v9, %v313_v5  ;;  %v561_v5 = vmul.f32 %v847_v4, %v1308_v8 }
 0x284   :  { %328 = vrot.lane.b32.xlu0 %v326_v6, %s1226_s1 }
 0x288   :  { %330 = vrot.lane.b32.xlu0 %v327_v7, %s1226_s1 }
 0x2f6   :  { %v329_v12 = vpop.permute.xlu0 %328 }
 0x2f7   :  { %v332_v14 = vadd.f32 %v329_v12, %v324_v11 }
 0x2f9   :  { %1073 = vmatprep.mubr.f32.mxu1 %v332_v14  ;;  %v1227_v14 = vmov 0.0  }
 0x2fa   :  { %v331_v16 = vpop.permute.xlu0 %330  ;;  %1118 = vmatprep.subr.mxu1 %v1227_v14 }
 0x2fb   :  { %v333_v17 = vadd.f32 %v331_v16, %v325_v15  ;;  %v662_v15 = vld [vmem:[#allocation2 + $0x270] sm:$0xff]  ;;  %v660_v16 = vld [vmem:[#allocation2 + $0x260] sm:$0xff] }
 0x2fd   :  { %1074 = vmatmul.mubr.f32.vlgmr.msra.gmra.mxu1 %v333_v17  ;;  %v659_v17 = vld [vmem:[#allocation2 + $0x258] sm:$0xff] }
 0x2fe   :  { %1119 = vmatpush3.msra.mxu1 %v663_v13  ;;  %1150 = vmatprep.mubr.msk.f32.mxu1 %vm1228_vm1, %v1227_v14 }
 0x2ff   :  { %1120 = vmatprep.subr.mxu1 %v1227_v14 }
 0x300   :  { %1121 = vmatpush3.msra.mxu1 %v662_v15 }
 0x301   :  { %1122 = vmatprep.subr.mxu1 %v1227_v14 }
 0x3bd   :  { %v1075_v21 = vpop.f32.mrf.mxu1 }
 0x3be   :  { %v430_v22 = vadd.f32 %v1075_v21, %v357_v19  ;;  %v657_v19 = vld [vmem:[#allocation2 + $0x248] sm:$0xff]  ;;  %v655_v21 = vld [vmem:[#allocation2 + $0x238] sm:$0xff] }
 0x3bf   :  { %v424_v23 = vpop.f32.mrf.mxu1 }
 0x3c0   :  { %v434_v24 = vmul.f32 0.01, %v430_v22  ;;  %v425_v25 = vadd.f32 %v424_v23, %v356_v20  ;;  %v656_v20 = vld [vmem:[#allocation2 + $0x240] sm:$0xff]  ;;  %v653_v23 = vld [vmem:[#allocation2 + $0x228] sm:$0xff] }
 0x3c2   :  { %v433_v26 = vmul.f32 0.01, %v425_v25  ;;  %v436_v27 = vmax.f32 %v430_v22, %v434_v24  ;;  %v654_v22 = vld [vmem:[#allocation2 + $0x230] sm:$0xff]  ;;  %v652_v24 = vld [vmem:[#allocation2 + $0x220] sm:$0xff] }
 0x3c4   :  { %v435_v28 = vmax.f32 %v425_v25, %v433_v26  ;;  %v438_v29 = vmul.f32 %v436_v27, %v436_v27  ;;  %v651_v25 = vld [vmem:[#allocation2 + $0x218] sm:$0xff]  ;;  %v650_v26 = vld [vmem:[#allocation2 + $0x210] sm:$0xff] }
 0x3c6   :  { %441 = vadd.xlane.f32.xlu1 %v438_v29  ;;  %v437_v30 = vmul.f32 %v435_v28, %v435_v28 }
 0x3ca   :  { %439 = vadd.xlane.f32.xlu1 %v437_v30  ;;  %v648_v30 = vld [vmem:[#allocation2 + $0x200] sm:$0xff] }
 0x44f   :  { %v442_v31 = vpop.xlane.xlu1 %441 }
 0x450   :  { %v444_v32 = vmax.f32 %v442_v31, 1e-24  ;;  %v756_v31 = vld [vmem:[#allocation2 + $0x2f8] sm:$0xff] }
 0x452   :  { %1195 = vrsqrt.f32 %v444_v32  ;;  %v755_v32 = vld [vmem:[#allocation2 + $0x2f0] sm:$0xff] }
 0x453   :  { %v440_v33 = vpop.xlane.xlu1 %439 }
 0x454   :  { %v443_v34 = vmax.f32 %v440_v33, 1e-24  ;;  %v754_v33 = vld [vmem:[#allocation2 + $0x2e8] sm:$0xff] }
 0x456   :  { %1197 = vrsqrt.f32 %v443_v34  ;;  %v753_v34 = vld [vmem:[#allocation2 + $0x2e0] sm:$0xff] }
 0x45f   :  { %v1196_v35 = vpop.eup %1195 }
 0x460   :  { %v1324_v36 = vmul.f32 %v1196_v35, %v436_v27  ;;  %v649_v27 = vld [vmem:[#allocation2 + $0x208] sm:$0xff]  ;;  %v752_v35 = vld [vmem:[#allocation2 + $0x2d8] sm:$0xff] }
 0x462   :  { %1076 = vmatprep.subr.mxu0 %v1324_v36  ;;  %v528_v61 = vmul.f32 %v1315_v10, %v1324_v36 }
 0x463   :  { %v1198_v37 = vpop.eup %1197  ;;  %1077 = vmatpush3.msra.mxu0 %v1324_v36 }
 0x464   :  { %v447_v38 = vmul.f32 %v1198_v37, %v435_v28  ;;  %v751_v37 = vld [vmem:[#allocation2 + $0x2d0] sm:$0xff] }
 0x466   :  { %1078 = vmatprep.subr.mxu0 %v447_v38  ;;  %v527_v60 = vmul.f32 %v1308_v8, %v447_v38  ;;  %v661_v8 = vld [vmem:[#allocation2 + $0x268] sm:$0xff] }
 0x467   :  { %1079 = vmatpush3.msra.mxu0 %v447_v38  ;;  %1123 = vmatpush3.msra.mxu1 %v661_v8 }
 0x468   :  { %1081 = vmatmul.mubr.msk.f32.vlgmr.msra.gmra.mxu0 %vm240_vm0, %v1295_v51  ;;  %1083 = vmatprep.subr.mxu0 %v555_v39  ;;  %v544_v51 = vld [vmem:[#allocation2 + $0x1a0] sm:$0xff] }
 0x469   :  { %1084 = vmatpush3.msra.mxu0 %v555_v39  ;;  %1124 = vmatprep.subr.mxu1 %v1227_v14  ;;  %v750_v39 = vld [vmem:[#allocation2 + $0x2c8] sm:$0xff] }
 0x46a   :  { %1085 = vmatprep.subr.mxu0 %v554_v40  ;;  %1125 = vmatpush3.msra.mxu1 %v660_v16 }
 0x46b   :  { %1086 = vmatpush3.msra.mxu0 %v554_v40  ;;  %1126 = vmatprep.subr.mxu1 %v1227_v14  ;;  %v749_v40 = vld [vmem:[#allocation2 + $0x2c0] sm:$0xff] }
 0x46c   :  { %1087 = vmatprep.subr.mxu0 %v553_v41  ;;  %1127 = vmatpush3.msra.mxu1 %v659_v17 }
 0x46d   :  { %1088 = vmatpush3.msra.mxu0 %v553_v41  ;;  %1128 = vmatprep.subr.mxu1 %v1227_v14  ;;  %v748_v41 = vld [vmem:[#allocation2 + $0x2b8] sm:$0xff] }
 0x46e   :  { %1089 = vmatprep.subr.mxu0 %v552_v42  ;;  %1129 = vmatpush3.msra.mxu1 %v658_v18 }
 0x46f   :  { %1090 = vmatpush3.msra.mxu0 %v552_v42  ;;  %1130 = vmatprep.subr.mxu1 %v1227_v14  ;;  %v747_v42 = vld [vmem:[#allocation2 + $0x2b0] sm:$0xff] }
 0x470   :  { %1091 = vmatprep.subr.mxu0 %v551_v43  ;;  %1131 = vmatpush3.msra.mxu1 %v657_v19 }
 0x471   :  { %1092 = vmatpush3.msra.mxu0 %v551_v43  ;;  %1132 = vmatprep.subr.mxu1 %v1227_v14  ;;  %v746_v43 = vld [vmem:[#allocation2 + $0x2a8] sm:$0xff] }
 0x472   :  { %1093 = vmatprep.subr.mxu0 %v550_v44  ;;  %1133 = vmatpush3.msra.mxu1 %v656_v20 }
 0x473   :  { %1094 = vmatpush3.msra.mxu0 %v550_v44  ;;  %1134 = vmatprep.subr.mxu1 %v1227_v14  ;;  %v745_v44 = vld [vmem:[#allocation2 + $0x2a0] sm:$0xff] }
 0x474   :  { %1095 = vmatprep.subr.mxu0 %v549_v45  ;;  %1135 = vmatpush3.msra.mxu1 %v655_v21 }
 0x475   :  { %1096 = vmatpush3.msra.mxu0 %v549_v45  ;;  %1136 = vmatprep.subr.mxu1 %v1227_v14  ;;  %v744_v45 = vld [vmem:[#allocation2 + $0x298] sm:$0xff] }
 0x476   :  { %1097 = vmatprep.subr.mxu0 %v548_v46  ;;  %1137 = vmatpush3.msra.mxu1 %v654_v22 }
 0x477   :  { %1098 = vmatpush3.msra.mxu0 %v548_v46  ;;  %1138 = vmatprep.subr.mxu1 %v1227_v14 }
 0x478   :  { %1099 = vmatprep.subr.mxu0 %v547_v47  ;;  %1139 = vmatpush3.msra.mxu1 %v653_v23 }
 0x479   :  { %1100 = vmatpush3.msra.mxu0 %v547_v47  ;;  %1140 = vmatprep.subr.mxu1 %v1227_v14 }
 0x47a   :  { %1101 = vmatprep.subr.mxu0 %v546_v48  ;;  %1141 = vmatpush3.msra.mxu1 %v652_v24 }
 0x47b   :  { %1102 = vmatpush3.msra.mxu0 %v546_v48  ;;  %1142 = vmatprep.subr.mxu1 %v1227_v14 }
 0x47c   :  { %1103 = vmatprep.subr.mxu0 %v545_v49  ;;  %1143 = vmatpush3.msra.mxu1 %v651_v25 }
 0x47d   :  { %1104 = vmatpush3.msra.mxu0 %v545_v49  ;;  %1144 = vmatprep.subr.mxu1 %v1227_v14 }
 0x47e   :  { %1105 = vmatprep.subr.mxu0 %v544_v51  ;;  %1145 = vmatpush3.msra.mxu1 %v650_v26 }
 0x47f   :  { %1106 = vmatpush3.msra.mxu0 %v544_v51  ;;  %1146 = vmatprep.subr.mxu1 %v1227_v14  ;;  %v743_v51 = vld [vmem:[#allocation2 + $0x290] sm:$0xff] }
 0x480   :  { %1107 = vmatprep.subr.mxu0 %v543_v52  ;;  %1147 = vmatpush3.msra.mxu1 %v649_v27 }
 0x481   :  { %1108 = vmatpush3.msra.mxu0 %v543_v52  ;;  %1148 = vmatprep.subr.mxu1 %v1227_v14  ;;  %v742_v52 = vld [vmem:[#allocation2 + $0x288] sm:$0xff] }
 0x482   :  { %1109 = vmatprep.subr.mxu0 %v542_v53  ;;  %1149 = vmatpush3.msra.mxu1 %v648_v30 }
 0x483   :  { %1110 = vmatpush3.msra.mxu0 %v542_v53  ;;  %v741_v53 = vld [vmem:[#allocation2 + $0x280] sm:$0xff] }
 0x484   :  { %1111 = vmatprep.subr.mxu0 %v541_v54 }
 0x485   :  { %1112 = vmatpush3.msra.mxu0 %v541_v54  ;;  %v848_v54 = vld [vmem:[%s1394_s4 + $0x4] ss:$0 sm:$0xff] }
 0x486   :  { %1113 = vmatprep.subr.mxu0 %v540_v55 }
 0x487   :  { %1114 = vmatpush3.msra.mxu0 %v540_v55 }
 0x488   :  { %1153 = vmatprep.subr.mxu0 %v1227_v14 }
 0x528   :  { %v1082_v56 = vpop.f32.mrf.mxu0 }
 0x529   :  { %v532_v57 = vmul.f32 %v1082_v56, %v1324_v36  ;;  %v530_v0 = vadd.f32 %v1082_v56, %v528_v61 }
 0x52a   :  { %v518_v58 = vpop.f32.mrf.mxu0 }
 0x52b   :  { %v531_v59 = vmul.f32 %v518_v58, %v447_v38  ;;  %535 = vrot.lane.b32.xlu1 %v532_v57, %s1226_s1  ;;  %v529_v62 = vadd.f32 %v527_v60, %v518_v58  ;;  %v849_v58 = vld [vmem:[%s1394_s4 + $0x5] ss:$0 sm:$0xff] }
 0x52d   :  { %533 = vrot.lane.b32.xlu0 %v531_v59, %s1226_s1 }
 0x52f   :  { %449 = vrot.lane.b32.xlu1 %v447_v38, %s1226_s1 }
 0x59d   :  { %v536_v63 = vpop.permute.xlu1 %535 }
 0x59e   :  { %v538_v3 = vadd.f32 %v536_v63, %v530_v0 }
 0x59f   :  { %v534_v1 = vpop.permute.xlu0 %533 }
 0x5a0   :  { %v537_v2 = vadd.f32 %v534_v1, %v529_v62 }
 0x5a1   :  { %v450_v46 = vpop.permute.xlu1 %449 }
 0x5a2   :  { %1115 = vmatprep.mubr.f32.mxu0 %v537_v2  ;;  %v451_v47 = vadd.f32 %v450_v46, %v1288_v50 }
 0x5a3   :  { %1116 = vmatmul.mubr.f32.vlgmr.msra.gmra.mxu0 %v538_v3 }
 0x5a4   :  { %1185 = vmatprep.mubr.msk.f32.mxu0 %vm1228_vm1, %v1227_v14  ;;  %1154 = vmatpush3.msra.mxu0 %v756_v31 }
 0x5a5   :  { %1155 = vmatprep.subr.mxu0 %v1227_v14 }
 0x5a6   :  { %1156 = vmatpush3.msra.mxu0 %v755_v32 }
 0x5a7   :  { %1157 = vmatprep.subr.mxu0 %v1227_v14 }
 0x5a8   :  { %1158 = vmatpush3.msra.mxu0 %v754_v33 }
 0x5a9   :  { %1159 = vmatprep.subr.mxu0 %v1227_v14 }
 0x5aa   :  { %1160 = vmatpush3.msra.mxu0 %v753_v34 }
 0x5ab   :  { %1161 = vmatprep.subr.mxu0 %v1227_v14 }
 0x5ac   :  { %1162 = vmatpush3.msra.mxu0 %v752_v35 }
 0x5ad   :  { %1163 = vmatprep.subr.mxu0 %v1227_v14 }
 0x5ae   :  { %1164 = vmatpush3.msra.mxu0 %v751_v37 }
 0x5af   :  { %1165 = vmatprep.subr.mxu0 %v1227_v14 }
 0x5b0   :  { %1166 = vmatpush3.msra.mxu0 %v750_v39 }
 0x5b1   :  { %1167 = vmatprep.subr.mxu0 %v1227_v14 }
 0x5b2   :  { %1168 = vmatpush3.msra.mxu0 %v749_v40 }
 0x5b3   :  { %1169 = vmatprep.subr.mxu0 %v1227_v14 }
 0x5b4   :  { %1170 = vmatpush3.msra.mxu0 %v748_v41 }
 0x5b5   :  { %1171 = vmatprep.subr.mxu0 %v1227_v14 }
 0x5b6   :  { %1172 = vmatpush3.msra.mxu0 %v747_v42 }
 0x5b7   :  { %1173 = vmatprep.subr.mxu0 %v1227_v14 }
 0x5b8   :  { %1174 = vmatpush3.msra.mxu0 %v746_v43 }
 0x5b9   :  { %1175 = vmatprep.subr.mxu0 %v1227_v14 }
 0x5ba   :  { %1176 = vmatpush3.msra.mxu0 %v745_v44 }
 0x5bb   :  { %1177 = vmatprep.subr.mxu0 %v1227_v14 }
 0x5bc   :  { %1178 = vmatpush3.msra.mxu0 %v744_v45 }
 0x5bd   :  { %1179 = vmatprep.subr.mxu0 %v1227_v14 }
 0x5be   :  { %1180 = vmatpush3.msra.mxu0 %v743_v51 }
 0x5bf   :  { %1181 = vmatprep.subr.mxu0 %v1227_v14 }
 0x5c0   :  { %1182 = vmatpush3.msra.mxu0 %v742_v52 }
 0x5c1   :  { %1183 = vmatprep.subr.mxu0 %v1227_v14 }
 0x5c2   :  { %1184 = vmatpush3.msra.mxu0 %v741_v53 }
 0x663   :  { %v1117_v6 = vpop.f32.mrf.mxu0 }
 0x665   :  { %v628_v7 = vpop.f32.mrf.mxu0 }
 0x666   :  { %v629_v9 = vadd.f32 %v628_v7, %v561_v5 }
 0x668   :  { %v636_v11 = vmul.f32 0.01, %v629_v9 }
 0x66a   :  { %v1341_v12 = vmax.f32 %v629_v9, %v636_v11 }
 0x66c   :  { %v638_v10 = vmul.f32 %v1341_v12, %v1341_v12 }
 0x66e   :  { %639 = vadd.xlane.f32.xlu0 %v638_v10 }
 0x6f7   :  { %v640_v28 = vpop.xlane.xlu0 %639 }
 0x6f8   :  { %v641_v29 = vmax.f32 %v640_v28, 1e-24 }
 0x6fa   :  { %1199 = vrsqrt.f32 %v641_v29 }
 0x707   :  { %v1200_v36 = vpop.eup %1199 }
 0x708   :  { %v643_v38 = vmul.f32 %v1200_v36, %v1341_v12 }
 0x70a   :  { %644 = vrot.lane.b32.xlu1 %v643_v38, %s1229_s21 }
 0x77c   :  { %v645_v48 = vpop.permute.xlu1 %644 }
 0x77d   :  { %v646_v49 = vadd.f32 %v645_v48, %v451_v47 }
 0x77f   :  { %1151 = vmatmul.mubr.f32.vlgmr.msra.gmra.mxu1 %v646_v49 }
 0x83f   :  { %v735_v55 = vpop.f32.mrf.mxu1 }
 0x840   :  { %v736_v56 = vadd.f32 %v848_v54, %v735_v55 }
 0x841   :  { %v1152_v50 = vpop.f32.mrf.mxu1 }
 0x842   :  { %v739_v57 = vmax.f32 %v736_v56, 0.0 }
 0x844   :  { %1186 = vmatmul.mubr.f32.vlgmr.msra.gmra.mxu0 %v739_v57 }
 0x904   :  { %v828_v59 = vpop.f32.mrf.mxu0 }
 0x905   :  { %v829_v60 = vadd.f32 %v849_v58, %v828_v59 }
 0x906   :  { %v1187_v61 = vpop.f32.mrf.mxu0 }
 0x907   :  { %832 = vst [vmem:[%s1395_s5] sm:$0xff] %v829_v60 }
 0x908   :  { %837 = vsyncpa [#allocation3], 1 }

</bundles_post_ra>
